<compile_context>
chip_gen: v7x
topology: tpu7x:2x2x1
jax: 0.10.0
libtpu: 0.0.40
codegen_flags: <defaults>
</compile_context>

<pallas_src>
import functools

import jax
import jax.numpy as jnp
from jax.experimental import pallas as pl
from jax.experimental.pallas import tpu as pltpu

LOG_STD_MIN = -20.0
LOG_STD_MAX = 2.0
HIDDEN = 64


def _round_up(x, m):
    return ((x + m - 1) // m) * m


def actor_kernel(x_ref, w1_ref, b1_ref, w2_ref, b2_ref, wh_ref, bh_ref,
                 o_ref, *, out_ch, vpu_fc1):
    """One batch tile: fused MLP + clamp/exp, single lane-dense output slab."""
    x = x_ref[...]                                   # [tb, in_ch] f32

    if vpu_fc1:
        # K is tiny (e.g. 4): do fc1 on the VPU as in_ch broadcast-FMAs over
        # the [tb, hidden] tile; keeps fc1 in full f32 and removes ~1/3 of the
        # MXU pushes (the binding slot for these layer widths).
        w1 = w1_ref[...]                             # [in_ch, hidden] f32
        in_ch = x.shape[1]
        acc = x[:, 0:1] * w1[0:1, :]
        for k in range(1, in_ch):
            acc = acc + x[:, k:k + 1] * w1[k:k + 1, :]
        h1 = acc + b1_ref[...]
    else:
        h1 = jnp.dot(x.astype(jnp.bfloat16),
                     w1_ref[...].astype(jnp.bfloat16),
                     preferred_element_type=jnp.float32) + b1_ref[...]
    h1 = jnp.maximum(h1, 0.0)

    # GEMM2 and the fused head GEMM run on the MXU with bf16 inputs / f32 acc.
    h2 = jnp.dot(h1.astype(jnp.bfloat16),
                 w2_ref[...].astype(jnp.bfloat16),
                 preferred_element_type=jnp.float32) + b2_ref[...]
    h2 = jnp.maximum(h2, 0.0)

    # Fused head: [tb, 2*out_ch] = [mu | log_std]
    head = jnp.dot(h2.astype(jnp.bfloat16),
                   wh_ref[...].astype(jnp.bfloat16),
                   preferred_element_type=jnp.float32) + bh_ref[...]

    # Columns >= out_ch are the log_std half -> clamp + exp; mu half passes
    # through untouched.  Column mask avoids cross-lane slice/concat.
    col = jax.lax.broadcasted_iota(jnp.int32, head.shape, 1)
    is_std = col >= out_ch
    std_vals = jnp.exp(jnp.clip(head, LOG_STD_MIN, LOG_STD_MAX))
    o_ref[...] = jnp.where(is_std, std_vals, head)


def prepare_actor_params(raw_params):
    """One-time prep: fuse the two head weights/biases and cast the MXU-side
    weight matrices to bf16 (done at init, not per forward call)."""
    w1, b1, w2, b2, wmu, bmu, wls, bls = raw_params
    wh = jnp.concatenate([wmu, wls], axis=1)
    bh = jnp.concatenate([bmu, bls], axis=1)
    return (
        w1.astype(jnp.float32), b1.astype(jnp.float32),     # fc1 stays f32 (VPU path)
        w2.astype(jnp.bfloat16), b2.astype(jnp.float32),
        wh.astype(jnp.bfloat16), bh.astype(jnp.float32),
    )


def actor_forward(x, prepared_params, *, tb=None):
    """x: [B, in_ch] float32. Returns (mu, std), each [B, out_ch] float32."""
    w1, b1, w2, b2, wh, bh = prepared_params
    batch, in_ch = x.shape
    hidden = w1.shape[1]
    head_w = wh.shape[1]
    out_ch = head_w // 2

    # Batch tile: multiple of 8 sublanes, big by default (per-row footprint is
    # tiny, so a 4096-row tile is still only a few MiB incl. intermediates).
    if tb is None:
        tb = min(4096, _round_up(batch, 8))
    tb = max(8, _round_up(tb, 8))
    # v7x: make sure there are >= 2 grid steps when there's enough batch so
    # the "parallel" axis can shard across both TensorCores (no-op elsewhere).
    min_padded = _round_up(batch, 8)
    if min_padded >= 16:
        tb = min(tb, _round_up(pl.cdiv(min_padded, 2), 8))

    padded_b = _round_up(batch, tb)
    if padded_b != batch:
        x = jnp.pad(x, ((0, padded_b - batch), (0, 0)))

    grid = (padded_b // tb,)
    vpu_fc1 = in_ch <= 8   # K tiny -> compute fc1 on the VPU instead of MXU

    # x / output tiled over batch; weights & biases VMEM-resident (same block
    # every grid iteration).
    in_specs = [
        pl.BlockSpec((tb, in_ch), lambda i: (i, 0)),          # x
        pl.BlockSpec((in_ch, hidden), lambda i: (0, 0)),      # w1 (f32)
        pl.BlockSpec((1, hidden), lambda i: (0, 0)),          # b1
        pl.BlockSpec((hidden, hidden), lambda i: (0, 0)),     # w2 (bf16)
        pl.BlockSpec((1, hidden), lambda i: (0, 0)),          # b2
        pl.BlockSpec((hidden, head_w), lambda i: (0, 0)),     # wh (bf16, mu|ls)
        pl.BlockSpec((1, head_w), lambda i: (0, 0)),          # bh (mu|ls)
    ]
    out_spec = pl.BlockSpec((tb, head_w), lambda i: (i, 0))

    flops = 2 * padded_b * (in_ch * hidden + hidden * hidden + hidden * head_w)
    bytes_accessed = (
        sum(int(a.size) * a.dtype.itemsize for a in (x, w1, b1, w2, b2, wh, bh))
        + padded_b * head_w * 4
    )
    cost = pl.CostEstimate(
        flops=flops,
        transcendentals=padded_b * head_w,
        bytes_accessed=bytes_accessed,
    )

    out = pl.pallas_call(
        functools.partial(actor_kernel, out_ch=out_ch, vpu_fc1=vpu_fc1),
        out_shape=jax.ShapeDtypeStruct((padded_b, head_w), jnp.float32),
        grid=grid,
        in_specs=in_specs,
        out_specs=out_spec,
        compiler_params=pltpu.CompilerParams(
            dimension_semantics=("parallel",),
        ),
        cost_estimate=cost,
    )(x, w1, b1, w2, b2, wh, bh)

    mu = out[:batch, :out_ch]
    std = out[:batch, out_ch:]
    return mu, std


def init_actor_params(key, in_channels, out_channels, hidden=HIDDEN):
    """Deterministic synthetic init (PyTorch-Linear-style uniform bounds)."""
    ks = jax.random.split(key, 8)

    def uinit(k, shape, fan_in):
        bound = 1.0 / jnp.sqrt(jnp.float32(fan_in))
        return jax.random.uniform(k, shape, jnp.float32, -bound, bound)

    w1 = uinit(ks[0], (in_channels, hidden), in_channels)
    b1 = uinit(ks[1], (1, hidden), in_channels)
    w2 = uinit(ks[2], (hidden, hidden), hidden)
    b2 = uinit(ks[3], (1, hidden), hidden)
    wmu = uinit(ks[4], (hidden, out_channels), hidden)
    bmu = uinit(ks[5], (1, out_channels), hidden)
    wls = uinit(ks[6], (hidden, out_channels), hidden)
    bls = uinit(ks[7], (1, out_channels), hidden)
    return (w1, b1, w2, b2, wmu, bmu, wls, bls)


def actor_forward_ref_f32(x, raw_params):
    """Pure-f32 JAX reference with the original module semantics."""
    w1, b1, w2, b2, wmu, bmu, wls, bls = raw_params
    h = jnp.maximum(x @ w1 + b1, 0.0)
    h = jnp.maximum(h @ w2 + b2, 0.0)
    mu = h @ wmu + bmu
    log_std = jnp.clip(h @ wls + bls, LOG_STD_MIN, LOG_STD_MAX)
    return mu, jnp.exp(log_std)


def actor_forward_ref_matched(x, prepared_params):
    """JAX reference matching the kernel's mixed-precision arithmetic
    (f32 fc1, bf16-input / f32-accumulate GEMM2 + head)."""
    w1, b1, w2, b2, wh, bh = prepared_params
    h = jnp.maximum(
        jnp.dot(x, w1, precision=jax.lax.Precision.HIGHEST) + b1, 0.0)
    h = jnp.maximum(
        jnp.dot(h.astype(jnp.bfloat16), w2,
                preferred_element_type=jnp.float32) + b2, 0.0)
    head = jnp.dot(h.astype(jnp.bfloat16), wh,
                   preferred_element_type=jnp.float32) + bh
    out_ch = wh.shape[1] // 2
    mu = head[:, :out_ch]
    log_std = jnp.clip(head[:, out_ch:], LOG_STD_MIN, LOG_STD_MAX)
    return mu, jnp.exp(log_std)


if __name__ == "__main__":
    key = jax.random.PRNGKey(0)
    k_x, k_p = jax.random.split(key)

    batch = 2
    in_channels = 4     # e.g. CartPole continuous-style state dim
    out_channels = 2    # action dim

    x = jax.random.normal(k_x, (batch, in_channels), dtype=jnp.float32)
    raw_params = init_actor_params(k_p, in_channels, out_channels)
    params = prepare_actor_params(raw_params)   # one-time: fuse heads, bf16 weights

    mu, std = actor_forward(x, params)
    jax.block_until_ready((mu, std))
    assert mu.shape == (batch, out_channels) and std.shape == (batch, out_channels)

    # Tight check vs a reference that mirrors the kernel's mixed precision.
    mu_m, std_m = actor_forward_ref_matched(x, params)
    assert jnp.allclose(mu, mu_m, atol=5e-3, rtol=5e-3)
    assert jnp.allclose(std, std_m, atol=5e-3, rtol=5e-3)
    # Semantic check vs the pure-f32 PyTorch-equivalent forward (bf16 GEMMs
    # introduce ~0.2-0.5% relative error).
    mu_f, std_f = actor_forward_ref_f32(x, raw_params)
    assert jnp.allclose(mu, mu_f, atol=5e-2, rtol=5e-2)
    assert jnp.allclose(std, std_f, atol=5e-2, rtol=5e-2)

    # Also exercise the batch grid / padding / multi-tile path.
    big_b = 1000
    xb = jax.random.normal(jax.random.PRNGKey(1), (big_b, in_channels), jnp.float32)
    mu_b, std_b = actor_forward(xb, params, tb=256)
    jax.block_until_ready((mu_b, std_b))
    mu_bm, std_bm = actor_forward_ref_matched(xb, params)
    assert jnp.allclose(mu_b, mu_bm, atol=5e-3, rtol=5e-3)
    assert jnp.allclose(std_b, std_bm, atol=5e-3, rtol=5e-3)
    mu_bf, std_bf = actor_forward_ref_f32(xb, raw_params)
    assert jnp.allclose(mu_b, mu_bf, atol=5e-2, rtol=5e-2)
    assert jnp.allclose(std_b, std_bf, atol=5e-2, rtol=5e-2)

    # Default-tile path (large tb + v7x >=2-grid-step cap).
    mu_d, std_d = actor_forward(xb, params)
    jax.block_until_ready((mu_d, std_d))
    assert jnp.allclose(mu_d, mu_bm, atol=5e-3, rtol=5e-3)
    assert jnp.allclose(std_d, std_bm, atol=5e-3, rtol=5e-3)

    print("KERNEL_OK")
</pallas_src>

<mosaic_0001>
module attributes {stable_mosaic.version = 11 : i64} {
  func.func @actor_kernel(%arg0: i32, %arg1: memref<8x4xf32, #tpu.memory_space<vmem>>, %arg2: memref<4x64xf32, #tpu.memory_space<vmem>>, %arg3: memref<1x64xf32, #tpu.memory_space<vmem>>, %arg4: memref<64x64xbf16, #tpu.memory_space<vmem>>, %arg5: memref<1x64xf32, #tpu.memory_space<vmem>>, %arg6: memref<64x4xbf16, #tpu.memory_space<vmem>>, %arg7: memref<1x4xf32, #tpu.memory_space<vmem>>, %arg8: memref<8x4xf32, #tpu.memory_space<vmem>>) attributes {dimension_semantics = [#tpu.dimension_semantics<parallel>], iteration_bounds = array<i64: 1>, scalar_prefetch = 0 : i64, scratch_operands = 0 : i64, tpu.core_type = #tpu.core_type<tc>, window_params = [{transform_indices = @transform_0, window_bounds = array<i64: 8, 4>}, {pipeline_mode = #tpu.pipeline_mode<synchronous>, transform_indices = @transform_1, window_bounds = array<i64: 4, 64>}, {pipeline_mode = #tpu.pipeline_mode<synchronous>, transform_indices = @transform_2, window_bounds = array<i64: 1, 64>}, {pipeline_mode = #tpu.pipeline_mode<synchronous>, transform_indices = @transform_3, window_bounds = array<i64: 64, 64>}, {pipeline_mode = #tpu.pipeline_mode<synchronous>, transform_indices = @transform_4, window_bounds = array<i64: 1, 64>}, {pipeline_mode = #tpu.pipeline_mode<synchronous>, transform_indices = @transform_5, window_bounds = array<i64: 64, 4>}, {pipeline_mode = #tpu.pipeline_mode<synchronous>, transform_indices = @transform_6, window_bounds = array<i64: 1, 4>}, {transform_indices = @transform_7, window_bounds = array<i64: 8, 4>}]} {
    %c0 = arith.constant 0 : index
    %c0_0 = arith.constant 0 : index
    %0 = vector.load %arg1[%c0, %c0_0] : memref<8x4xf32, #tpu.memory_space<vmem>>, vector<8x4xf32>
    %c0_1 = arith.constant 0 : index
    %c0_2 = arith.constant 0 : index
    %1 = vector.load %arg2[%c0_1, %c0_2] : memref<4x64xf32, #tpu.memory_space<vmem>>, vector<4x64xf32>
    %2 = vector.extract_strided_slice %0 {offsets = [0, 0], sizes = [8, 1], strides = [1, 1]} : vector<8x4xf32> to vector<8x1xf32>
    %3 = vector.extract_strided_slice %1 {offsets = [0, 0], sizes = [1, 64], strides = [1, 1]} : vector<4x64xf32> to vector<1x64xf32>
    %4 = vector.broadcast %2 : vector<8x1xf32> to vector<8x64xf32>
    %5 = vector.broadcast %3 : vector<1x64xf32> to vector<8x64xf32>
    %6 = arith.mulf %4, %5 : vector<8x64xf32>
    %7 = vector.extract_strided_slice %0 {offsets = [0, 1], sizes = [8, 1], strides = [1, 1]} : vector<8x4xf32> to vector<8x1xf32>
    %8 = vector.extract_strided_slice %1 {offsets = [1, 0], sizes = [1, 64], strides = [1, 1]} : vector<4x64xf32> to vector<1x64xf32>
    %9 = vector.broadcast %7 : vector<8x1xf32> to vector<8x64xf32>
    %10 = vector.broadcast %8 : vector<1x64xf32> to vector<8x64xf32>
    %11 = arith.mulf %9, %10 : vector<8x64xf32>
    %12 = arith.addf %6, %11 : vector<8x64xf32>
    %13 = vector.extract_strided_slice %0 {offsets = [0, 2], sizes = [8, 1], strides = [1, 1]} : vector<8x4xf32> to vector<8x1xf32>
    %14 = vector.extract_strided_slice %1 {offsets = [2, 0], sizes = [1, 64], strides = [1, 1]} : vector<4x64xf32> to vector<1x64xf32>
    %15 = vector.broadcast %13 : vector<8x1xf32> to vector<8x64xf32>
    %16 = vector.broadcast %14 : vector<1x64xf32> to vector<8x64xf32>
    %17 = arith.mulf %15, %16 : vector<8x64xf32>
    %18 = arith.addf %12, %17 : vector<8x64xf32>
    %19 = vector.extract_strided_slice %0 {offsets = [0, 3], sizes = [8, 1], strides = [1, 1]} : vector<8x4xf32> to vector<8x1xf32>
    %20 = vector.extract_strided_slice %1 {offsets = [3, 0], sizes = [1, 64], strides = [1, 1]} : vector<4x64xf32> to vector<1x64xf32>
    %21 = vector.broadcast %19 : vector<8x1xf32> to vector<8x64xf32>
    %22 = vector.broadcast %20 : vector<1x64xf32> to vector<8x64xf32>
    %23 = arith.mulf %21, %22 : vector<8x64xf32>
    %24 = arith.addf %18, %23 : vector<8x64xf32>
    %c0_3 = arith.constant 0 : index
    %c0_4 = arith.constant 0 : index
    %25 = vector.load %arg3[%c0_3, %c0_4] : memref<1x64xf32, #tpu.memory_space<vmem>>, vector<1x64xf32>
    %26 = vector.broadcast %25 : vector<1x64xf32> to vector<8x64xf32>
    %27 = arith.addf %24, %26 : vector<8x64xf32>
    %cst = arith.constant 0.000000e+00 : f32
    %28 = vector.broadcast %cst : f32 to vector<8x64xf32>
    %29 = arith.maximumf %27, %28 : vector<8x64xf32>
    %30 = arith.truncf %29 : vector<8x64xf32> to vector<8x64xbf16>
    %c0_5 = arith.constant 0 : index
    %c0_6 = arith.constant 0 : index
    %31 = vector.load %arg4[%c0_5, %c0_6] : memref<64x64xbf16, #tpu.memory_space<vmem>>, vector<64x64xbf16>
    %cst_7 = arith.constant dense<0.000000e+00> : vector<8x64xf32>
    %32 = tpu.matmul %30, %31, %cst_7 {dimension_numbers = #tpu.dot_dimension_numbers<[1], [0], [0], [1], [0, 0, 1, 1], [], []>} : vector<8x64xbf16>, vector<64x64xbf16>, vector<8x64xf32> -> vector<8x64xf32>
    %c0_8 = arith.constant 0 : index
    %c0_9 = arith.constant 0 : index
    %33 = vector.load %arg5[%c0_8, %c0_9] : memref<1x64xf32, #tpu.memory_space<vmem>>, vector<1x64xf32>
    %34 = vector.broadcast %33 : vector<1x64xf32> to vector<8x64xf32>
    %35 = arith.addf %32, %34 : vector<8x64xf32>
    %cst_10 = arith.constant 0.000000e+00 : f32
    %36 = vector.broadcast %cst_10 : f32 to vector<8x64xf32>
    %37 = arith.maximumf %35, %36 : vector<8x64xf32>
    %38 = arith.truncf %37 : vector<8x64xf32> to vector<8x64xbf16>
    %c0_11 = arith.constant 0 : index
    %c0_12 = arith.constant 0 : index
    %39 = vector.load %arg6[%c0_11, %c0_12] : memref<64x4xbf16, #tpu.memory_space<vmem>>, vector<64x4xbf16>
    %cst_13 = arith.constant dense<0.000000e+00> : vector<8x4xf32>
    %40 = tpu.matmul %38, %39, %cst_13 {dimension_numbers = #tpu.dot_dimension_numbers<[1], [0], [0], [1], [0, 0, 1, 1], [], []>} : vector<8x64xbf16>, vector<64x4xbf16>, vector<8x4xf32> -> vector<8x4xf32>
    %c0_14 = arith.constant 0 : index
    %c0_15 = arith.constant 0 : index
    %41 = vector.load %arg7[%c0_14, %c0_15] : memref<1x4xf32, #tpu.memory_space<vmem>>, vector<1x4xf32>
    %42 = vector.broadcast %41 : vector<1x4xf32> to vector<8x4xf32>
    %43 = arith.addf %40, %42 : vector<8x4xf32>
    %44 = tpu.iota {dimensions = array<i32: 1>} : vector<8x4xi32>
    %c2_i32 = arith.constant 2 : i32
    %45 = vector.broadcast %c2_i32 : i32 to vector<8x4xi32>
    %46 = arith.cmpi sge, %44, %45 : vector<8x4xi32>
    %cst_16 = arith.constant -2.000000e+01 : f32
    %cst_17 = arith.constant 2.000000e+00 : f32
    %47 = vector.broadcast %cst_16 : f32 to vector<8x4xf32>
    %48 = arith.maximumf %47, %43 : vector<8x4xf32>
    %49 = vector.broadcast %cst_17 : f32 to vector<8x4xf32>
    %50 = arith.minimumf %49, %48 : vector<8x4xf32>
    %51 = math.exp %50 : vector<8x4xf32>
    %52 = arith.select %46, %51, %43 : vector<8x4xi1>, vector<8x4xf32>
    %c0_18 = arith.constant 0 : index
    %c0_19 = arith.constant 0 : index
    %53 = vector.load %arg8[%c0_18, %c0_19] : memref<8x4xf32, #tpu.memory_space<vmem>>, vector<8x4xf32>
    tpu.vector_store %arg8[%c0_18, %c0_19], %52 {strides = array<i32>} : memref<8x4xf32, #tpu.memory_space<vmem>>, vector<8x4xf32>,
    return
  }
  func.func @transform_0(%arg0: i32) -> (i32, i32) {
    %c0_i32 = arith.constant 0 : i32
    %c0_i32_0 = arith.constant 0 : i32
    return %arg0, %c0_i32 : i32, i32
  }
  func.func @transform_1(%arg0: i32) -> (i32, i32) {
    %c0_i32 = arith.constant 0 : i32
    %c0_i32_0 = arith.constant 0 : i32
    %c0_i32_1 = arith.constant 0 : i32
    return %c0_i32, %c0_i32_0 : i32, i32
  }
  func.func @transform_2(%arg0: i32) -> (i32, i32) {
    %c0_i32 = arith.constant 0 : i32
    %c0_i32_0 = arith.constant 0 : i32
    %c0_i32_1 = arith.constant 0 : i32
    return %c0_i32, %c0_i32_0 : i32, i32
  }
  func.func @transform_3(%arg0: i32) -> (i32, i32) {
    %c0_i32 = arith.constant 0 : i32
    %c0_i32_0 = arith.constant 0 : i32
    %c0_i32_1 = arith.constant 0 : i32
    return %c0_i32, %c0_i32_0 : i32, i32
  }
  func.func @transform_4(%arg0: i32) -> (i32, i32) {
    %c0_i32 = arith.constant 0 : i32
    %c0_i32_0 = arith.constant 0 : i32
    %c0_i32_1 = arith.constant 0 : i32
    return %c0_i32, %c0_i32_0 : i32, i32
  }
  func.func @transform_5(%arg0: i32) -> (i32, i32) {
    %c0_i32 = arith.constant 0 : i32
    %c0_i32_0 = arith.constant 0 : i32
    %c0_i32_1 = arith.constant 0 : i32
    return %c0_i32, %c0_i32_0 : i32, i32
  }
  func.func @transform_6(%arg0: i32) -> (i32, i32) {
    %c0_i32 = arith.constant 0 : i32
    %c0_i32_0 = arith.constant 0 : i32
    %c0_i32_1 = arith.constant 0 : i32
    return %c0_i32, %c0_i32_0 : i32, i32
  }
  func.func @transform_7(%arg0: i32) -> (i32, i32) {
    %c0_i32 = arith.constant 0 : i32
    %c0_i32_0 = arith.constant 0 : i32
    return %arg0, %c0_i32 : i32, i32
  }
}

</mosaic_0001>

<bundles_post_ra>
// kernel: tpu_custom_call.1
= control target key start
LH: loop header
LB: loop body
LE: loop exit
PB: predicated region body
PF: predicated region fallthrough
CT: control target
= control target key end

     0   :  { %v328_v0 = vmov 0   ;;  %v329_v2 = vmov 2   ;;  %v330_v3 = vmov 0.0   ;;  %v331_v5 = vmov 1   ;;  %s418_s0 = inlined_call_operand.vmem [shape: f32[8,4], index: 0, kind: input, shape index: {}]   ;;  %s419_s3 = inlined_call_operand.vmem [shape: bf16[64,64], index: 3, kind: input, shape index: {}]   ;;  %s420_s5 = inlined_call_operand.vmem [shape: bf16[64,4], index: 5, kind: input, shape index: {}]   ;;  %s421_s1 = inlined_call_operand.vmem [shape: f32[4,64], index: 1, kind: input, shape index: {}]   ;;  %s422_s2 = inlined_call_operand.vmem [shape: f32[1,64], index: 2, kind: input, shape index: {}]   ;;  %s423_s4 = inlined_call_operand.vmem [shape: f32[1,64], index: 4, kind: input, shape index: {}]   ;;  %s424_s6 = inlined_call_operand.vmem [shape: f32[1,4], index: 6, kind: input, shape index: {}]   ;;  %s425_s7 = inlined_call_operand.vmem [shape: f32[8,4], index: 7, kind: output, shape index: {}]  }
   0x1   :  { %313 = vset.pattern.permute.xlu0 %v328_v0  ;;  %v27_v1 = vld [vmem:[%s418_s0] sm:$0xff]  ;;  %315 = vset.pattern.permute.xlu1 %v329_v2  ;;  %v332_v6 = vmov 3   ;;  %v319_v7 = vld [vmem:[%s419_s3 + $0x8] sm:$0xff]   ;;  %v320_v8 = vld [vmem:[%s419_s3 + $0x10] sm:$0xff]   ;;  %vm333_vm0 = vmmov 0   ;;  %v34_v12 = vlaneseq  ;;  %vm118_vm1 = vcmask 523264  }
   0x2   :  { %31 = vperm.xlu0 %313, %v27_v1   ;;  %50 = vperm.xlu1 %315, %v27_v1   ;;  %v318_v4 = vld [vmem:[%s419_s3] sm:$0xff]   ;;  %v321_v9 = vld [vmem:[%s419_s3 + $0x18] sm:$0xff]   ;;  %v323_v11 = vld [vmem:[%s420_s5 + $0x8] sm:$0xff]   ;;  %vm254_vm3 = vcmask 31744  }
   0x3   :  { %283 = vmatprep.subr.bf16.mxu0 %v330_v3  ;;  %295 = vmatprep.subr.bf16.mxu1 %v330_v3  ;;  %v322_v10 = vld [vmem:[%s420_s5] sm:$0xff]   ;;  %v35_v13 = vshrl.u32 %v34_v12, 7  ;;  %v324_v38 = vld [vmem:[%s420_s5 + $0x10] sm:$0xff]   ;;  %v325_v39 = vld [vmem:[%s420_s5 + $0x18] sm:$0xff]   ;;  %v247_v57 = vand.u32 127, %v34_v12 }
   0x4   :  { %284 = vmatpush3.bf16.msra.mxu0 %v318_v4  ;;  %291 = vmatprep.mubr.msk.bf16.mxu0 %vm333_vm0, %v330_v3  ;;  %v28_v16 = vld [vmem:[%s421_s1] sm:$0xf] }
   0x5   :  { %285 = vmatprep.subr.bf16.mxu0 %v330_v3  ;;  %303 = vmatprep.mubr.msk.bf16.mxu1 %vm333_vm0, %v330_v3  ;;  %v36_v14 = vsub.s32 0, %v35_v13  ;;  %v45_v15 = vsub.s32 1, %v35_v13  ;;  %v55_v18 = vsub.s32 2, %v35_v13  ;;  %v65_v20 = vsub.s32 3, %v35_v13  ;;  %v260_v33 = vld [vmem:[%s422_s2] ss:$0 sm:$0xff] }
   0x6   :  { %314 = vset.pattern.permute.xlu0 %v331_v5  ;;  %316 = vset.pattern.permute.xlu1 %v332_v6  ;;  %v261_v40 = vld [vmem:[%s423_s4] ss:$0 sm:$0xff]  ;;  %vm248_vm2 = vcmp.ge.s32.totalorder %v247_v57, 2 }
   0x7   :  { %40 = vperm.xlu0 %314, %v27_v1   ;;  %60 = vperm.xlu1 %316, %v27_v1   ;;  %v37_v21 = vrot.slane %v28_v16, %v36_v14  ;;  %v46_v22 = vrot.slane %v28_v16, %v45_v15  ;;  %v56_v23 = vrot.slane %v28_v16, %v55_v18  ;;  %v267_v48 = vld [vmem:[%s424_s6] ss:$0 sm:$0xff] }
   0x8   :  { %286 = vmatpush3.bf16.msra.mxu0 %v319_v7  ;;  %296 = vmatpush3.bf16.msra.mxu1 %v322_v10  ;;  %v66_v24 = vrot.slane %v28_v16, %v65_v20 }
   0x9   :  { %287 = vmatprep.subr.bf16.mxu0 %v330_v3  ;;  %297 = vmatprep.subr.bf16.mxu1 %v330_v3 }
   0xb   :  { %317 = vset.pattern.permute.xlu0 %v332_v6 }
   0xc   :  { %288 = vmatpush3.bf16.msra.mxu0 %v320_v8  ;;  %298 = vmatpush3.bf16.msra.mxu1 %v323_v11 }
   0xd   :  { %289 = vmatprep.subr.bf16.mxu0 %v330_v3  ;;  %299 = vmatprep.subr.bf16.mxu1 %v330_v3 }
  0x10   :  { %290 = vmatpush3.bf16.msra.mxu0 %v321_v9  ;;  %300 = vmatpush3.bf16.msra.mxu1 %v324_v38 }
  0x11   :  { %301 = vmatprep.subr.bf16.mxu1 %v330_v3 }
  0x14   :  { %302 = vmatpush3.bf16.msra.mxu1 %v325_v39 }
  0x81   :  { %v32_v17 = vpop.permute.xlu0 %31  ;;  %v51_v19 = vpop.permute.xlu1 %50 }
  0x82   :  { %v38_v27 = vmul.f32 %v37_v21, %v32_v17  ;;  %v57_v29 = vmul.f32 %v56_v23, %v51_v19 }
  0x86   :  { %v41_v25 = vpop.permute.xlu0 %40  ;;  %v61_v26 = vpop.permute.xlu1 %60 }
  0x87   :  { %v47_v28 = vmul.f32 %v46_v22, %v41_v25  ;;  %v67_v31 = vmul.f32 %v66_v24, %v61_v26 }
  0x89   :  { %v48_v30 = vadd.f32 %v47_v28, %v38_v27 }
  0x8b   :  { %v58_v32 = vadd.f32 %v57_v29, %v48_v30 }
  0x8d   :  { %v68_v34 = vadd.f32 %v67_v31, %v58_v32 }
  0x8f   :  { %v76_v35 = vadd.f32 %v260_v33, %v68_v34 }
  0x91   :  { %v77_v36 = vmax.f32 %v76_v35, 0.0 }
  0x93   :  { %v78_v37 = vpack.c.bf16 %v77_v36, %v77_v36 }
  0x95   :  { %292 = vmatmul.mubr.msk.bf16.vlgmr.msra.gmra.mrb[0].mxu0 %vm118_vm1, %v78_v37 }
 0x168   :  { %v156_v41 = vpop.f32.mrb[0].mxu0 }
 0x169   :  { %v157_v42 = vadd.f32 %v261_v40, %v156_v41  ;;  %v293_v43 = vpop.f32.mrb[1].mxu0 }
 0x16a   :  { %v159_v44 = vpop.f32.mrb[2].mxu0 }
 0x16b   :  { %v162_v45 = vmax.f32 %v157_v42, 0.0  ;;  %v294_v46 = vpop.f32.mrb[3].mxu0 }
 0x16d   :  { %v163_v47 = vpack.c.bf16 %v162_v45, %v162_v45 }
 0x16f   :  { %304 = vmatmul.mubr.msk.bf16.vlgmr.msra.gmra.mrb[0].mxu1 %vm118_vm1, %v163_v47 }
 0x242   :  { %v240_v49 = vpop.f32.mrb[0].mxu1 }
 0x243   :  { %v241_v50 = vadd.f32 %v267_v48, %v240_v49  ;;  %v305_v51 = vpop.f32.mrb[1].mxu1 }
 0x244   :  { %v243_v52 = vpop.f32.mrb[2].mxu1 }
 0x245   :  { %v249_v53 = vmax.f32 %v241_v50, -20.0  ;;  %v306_v54 = vpop.f32.mrb[3].mxu1 }
 0x247   :  { %v250_v55 = vmin.f32 %v249_v53, 2.0 }
 0x249   :  { %v251_v56 = vmul.f32 1.442695, %v250_v55 }
 0x24b   :  { %326 = vpow2.f32 %v251_v56 }
 0x255   :  { %v327_v58 = vpop.eup %326 }
 0x256   :  { %v253_v59 = vsel %vm248_vm2, %v327_v58, %v241_v50 }
 0x257   :  { %255 = vst.msk [vmem:[%s425_s7] sm:$0xff] %vm254_vm3, %v253_v59 }

</bundles_post_ra>
